<compile_context>
chip_gen: v5e
topology: v5e:2x2
jax: 0.10.0
libtpu: 0.0.40
codegen_flags: <defaults>
</compile_context>

<pallas_src>
import functools

import jax
import jax.numpy as jnp
from jax.experimental import pallas as pl
from jax.experimental.pallas import tpu as pltpu


def _round_up(x, m):
    return ((x + m - 1) // m) * m


def _make_qfunc_kernel(num_hidden, with_layer_norm, hidden_dims, eps=1e-5,
                       matmul_dtype=jnp.float32):
    """kernel(x_ref, *param_refs, out_ref) for the Qfunc MLP (transposed).

    Activations live as (features, batch_tile).  Param layout per hidden
    layer i:
        Wt_i (h_i_pad, in_pad)  [matmul_dtype],
        b_i  (h_i_pad, 1)       [f32],
        [gamma_i (h_i_pad, 1), beta_i (h_i_pad, 1)]   (LayerNorm only)
    followed by the output layer: w_col (h_last_pad, 1), b_out (1, 1).
    """
    per_layer = 4 if with_layer_norm else 2

    def kernel(*refs):
        x_ref = refs[0]               # (TB, F)
        out_ref = refs[-1]            # (1, TB)  lane-dense
        p = refs[1:-1]

        x = x_ref[...].astype(matmul_dtype)          # (TB, F)
        h = None
        for i in range(num_hidden):
            base = i * per_layer
            w = p[base][...].astype(matmul_dtype)    # (h_i_pad, in_pad)
            b = p[base + 1][...]                     # (h_i_pad, 1) f32
            if i == 0:
                # h = W0 @ x^T, expressed as an A @ B^T contraction on the
                # MXU (no explicit transpose of the input tile).
                h = jax.lax.dot_general(
                    w, x, dimension_numbers=(((1,), (1,)), ((), ())),
                    preferred_element_type=jnp.float32)
            else:
                h = jnp.dot(w, h.astype(matmul_dtype),
                            preferred_element_type=jnp.float32)
            h = h + b                                # (h_i_pad, TB) f32
            if with_layer_norm:
                gamma = p[base + 2][...]             # (h_i_pad, 1)
                beta = p[base + 3][...]              # (h_i_pad, 1)
                n_true = hidden_dims[i]
                h_pad = h.shape[0]
                # Pad feature rows are exactly 0 before centering, so the
                # full-width sum equals the true-width sum.
                mean = jnp.sum(h, axis=0, keepdims=True) * (1.0 / n_true)
                centered = h - mean
                if h_pad != n_true:
                    # Pad rows become -mean after centering; mask them out of
                    # the variance (two cheap VPU ops).
                    row = jax.lax.broadcasted_iota(jnp.int32, h.shape, 0)
                    centered_m = jnp.where(row < n_true, centered, 0.0)
                else:
                    centered_m = centered
                var = (jnp.sum(centered_m * centered_m, axis=0, keepdims=True)
                       * (1.0 / n_true))
                # gamma/beta are zero-padded, so pad rows return to 0 here.
                h = centered * jax.lax.rsqrt(var + eps) * gamma + beta
            h = jnp.maximum(h, 0.0)                  # ReLU (f32, VPU)

        # Output layer Linear(h_last, 1): VPU multiply + sublane reduction
        # instead of a degenerate M=1 MXU matmul; the result is already a
        # lane-dense (1, TB) row, stored unmasked.
        w_col = p[num_hidden * per_layer][...]       # (h_last_pad, 1) f32
        b_out = p[num_hidden * per_layer + 1][...]   # (1, 1) f32
        q = jnp.sum(h * w_col, axis=0, keepdims=True) + b_out
        out_ref[...] = q.astype(out_ref.dtype)

    return kernel


def init_qfunc_params(key, obs_action_dim, hiddens, with_layer_norm=False):
    """Deterministic nn.Linear-like init. W stored (in, out), b (1, out)."""
    params = []
    in_dim = obs_action_dim
    dims = list(hiddens) + [1]
    for i, out_dim in enumerate(dims):
        key, kw, kb = jax.random.split(key, 3)
        bound = 1.0 / jnp.sqrt(jnp.float32(in_dim))
        w = jax.random.uniform(kw, (in_dim, out_dim), jnp.float32, -bound, bound)
        b = jax.random.uniform(kb, (1, out_dim), jnp.float32, -bound, bound)
        params.append(w)
        params.append(b)
        if with_layer_norm and i < len(hiddens):
            params.append(jnp.ones((1, out_dim), jnp.float32))   # gamma
            params.append(jnp.zeros((1, out_dim), jnp.float32))  # beta
        in_dim = out_dim
    return params


def pack_qfunc_params(params, obs_action_dim, hiddens, with_layer_norm=False,
                      matmul_dtype=jnp.float32):
    """Pack params for the transposed-compute kernel.

    Weights are stored transposed ((out, in), PyTorch's native layout) in
    matmul_dtype, with hidden dims zero-padded to multiples of 128.  The
    input feature dim (layer 0's in-dim) is left UNPADDED so the x DMA stays
    at F columns.  Biases / LN params become (out_pad, 1) f32 columns (zero
    on pad rows, so padded features stay exactly 0 through the network).
    """
    hiddens = list(hiddens)
    per_layer = 4 if with_layer_norm else 2
    hp = [_round_up(h, 128) for h in hiddens]
    in_pad = [obs_action_dim] + hp[:-1]          # padded in-dims (layer 0 raw)
    in_true = [obs_action_dim] + hiddens[:-1]

    packed = []
    for i, h_true in enumerate(hiddens):
        w = params[i * per_layer]                # (in_true, h_true)
        b = params[i * per_layer + 1]            # (1, h_true)
        wt = jnp.zeros((hp[i], in_pad[i]), jnp.float32)
        wt = wt.at[:h_true, :in_true[i]].set(w.T)
        bt = jnp.zeros((hp[i], 1), jnp.float32).at[:h_true, 0].set(b[0])
        packed.append(wt.astype(matmul_dtype))
        packed.append(bt)
        if with_layer_norm:
            g = params[i * per_layer + 2]        # (1, h_true)
            be = params[i * per_layer + 3]       # (1, h_true)
            gt = jnp.zeros((hp[i], 1), jnp.float32).at[:h_true, 0].set(g[0])
            bet = jnp.zeros((hp[i], 1), jnp.float32).at[:h_true, 0].set(be[0])
            packed += [gt, bet]

    w_out = params[len(hiddens) * per_layer]      # (h_last, 1)
    b_out = params[len(hiddens) * per_layer + 1]  # (1, 1)
    w_col = jnp.zeros((hp[-1], 1), jnp.float32).at[:hiddens[-1], :].set(w_out)
    packed += [w_col, b_out]
    return packed


@functools.partial(jax.jit, static_argnums=(2, 3, 4, 5))
def qfunc_forward(obs_action, packed_params, hiddens, with_layer_norm,
                  matmul_dtype, block_b):
    """Pallas forward for Qfunc.net(obs_action). Returns (B, 1) float32."""
    B, F = obs_action.shape
    hiddens = tuple(hiddens)
    num_hidden = len(hiddens)

    # Batch tiling.  Multi-tile lane-dense output blocks need TB % 128 == 0;
    # keep >= 2 grid steps for large batches so ("parallel",) can use both
    # v7x TensorCores.
    B8 = _round_up(max(B, 1), 8)
    if B8 >= 512:
        tb_cap = max(128, (block_b // 128) * 128)
        TB = min(tb_cap, _round_up((B8 + 1) // 2, 128))
        B_pad = _round_up(B8, TB)
    else:
        TB = B8
        B_pad = B8

    x = obs_action
    if B_pad != B:
        # Only pad batch rows, and only when needed; no feature padding.
        x = jnp.pad(x, ((0, B_pad - B), (0, 0)))

    kernel = _make_qfunc_kernel(num_hidden, with_layer_norm, hiddens,
                                matmul_dtype=matmul_dtype)

    grid = (B_pad // TB,)
    in_specs = [pl.BlockSpec((TB, F), lambda i: (i, 0))]
    in_specs += [pl.BlockSpec(p.shape, lambda i: (0, 0)) for p in packed_params]
    out_specs = pl.BlockSpec((1, TB), lambda i: (0, i))   # lane-dense output

    # Cost estimate + VMEM sizing (padded dims; leave headroom on v7x 64 MiB).
    dims = [F] + [_round_up(h, 128) for h in hiddens]
    flops = 0
    for i in range(num_hidden):
        flops += 2 * B_pad * dims[i] * dims[i + 1]
    flops += 2 * B_pad * dims[-1]
    transcendentals = B_pad * num_hidden if with_layer_norm else 0
    x_itemsize = x.dtype.itemsize
    param_bytes = sum(int(p.size) * p.dtype.itemsize for p in packed_params)
    bytes_accessed = int(B_pad * F * x_itemsize + param_bytes + B_pad * 4)
    hp_max = max(dims[1:])
    vmem_bytes = int(2 * TB * F * x_itemsize        # double-buffered input
                     + 2 * TB * 4                   # double-buffered output
                     + 2 * param_bytes              # resident params
                     + 6 * hp_max * TB * 4          # live activations / temps
                     + (4 << 20))                   # headroom
    vmem_bytes = min(vmem_bytes, 48 << 20)

    out = pl.pallas_call(
        kernel,
        out_shape=jax.ShapeDtypeStruct((1, B_pad), jnp.float32),
        grid=grid,
        in_specs=in_specs,
        out_specs=out_specs,
        compiler_params=pltpu.CompilerParams(
            dimension_semantics=("parallel",),
            vmem_limit_bytes=vmem_bytes),
        cost_estimate=pl.CostEstimate(
            flops=int(flops),
            transcendentals=int(transcendentals),
            bytes_accessed=bytes_accessed),
    )(x, *packed_params)
    return out[0, :B][:, None]


def qfunc_reference(obs_action, params, num_hidden, with_layer_norm=False,
                    eps=1e-5, operand_dtype=jnp.float32):
    """Pure-JAX reference (unpadded params, (in, out) weights).

    With operand_dtype=bfloat16 it mirrors the kernel's bf16-operand /
    f32-accumulate matmuls for tight comparison.
    """
    per_layer = 4 if with_layer_norm else 2
    h = obs_action.astype(jnp.float32)
    for i in range(num_hidden):
        base = i * per_layer
        h = jnp.dot(h.astype(operand_dtype),
                    params[base].astype(operand_dtype),
                    preferred_element_type=jnp.float32) + params[base + 1]
        if with_layer_norm:
            mean = jnp.mean(h, axis=-1, keepdims=True)
            var = jnp.mean((h - mean) ** 2, axis=-1, keepdims=True)
            h = (h - mean) / jnp.sqrt(var + eps)
            h = h * params[base + 2] + params[base + 3]
        h = jnp.maximum(h, 0.0)
    return (h @ params[num_hidden * per_layer]
            + params[num_hidden * per_layer + 1])


if __name__ == "__main__":
    obs_action_dim = 32
    hiddens = (64, 64)
    num_hidden = len(hiddens)

    key = jax.random.PRNGKey(0)

    # --- 1) default config (no LN), small batch, f32 matmul: exactness -----
    key, kx, kp = jax.random.split(key, 3)
    B = 8
    obs_action = jax.random.normal(kx, (B, obs_action_dim), jnp.float32)
    params = init_qfunc_params(kp, obs_action_dim, hiddens, with_layer_norm=False)
    packed_f32 = pack_qfunc_params(params, obs_action_dim, hiddens, False,
                                   matmul_dtype=jnp.float32)
    out = jax.block_until_ready(
        qfunc_forward(obs_action, packed_f32, hiddens, False, jnp.float32, 1024))
    ref = qfunc_reference(obs_action, params, num_hidden, False)
    assert out.shape == (B, 1), out.shape
    assert jnp.allclose(out, ref, atol=1e-5, rtol=1e-5), "mismatch (f32, no LN)"

    # --- 2) large batch, bf16 MXU operands, 2 grid steps (megacore) --------
    packed_bf16 = pack_qfunc_params(params, obs_action_dim, hiddens, False,
                                    matmul_dtype=jnp.bfloat16)
    key, kx2 = jax.random.split(key)
    B2 = 1024
    obs_action2 = jax.random.normal(kx2, (B2, obs_action_dim), jnp.float32)
    out2 = jax.block_until_ready(
        qfunc_forward(obs_action2, packed_bf16, hiddens, False,
                      jnp.bfloat16, 1024))
    ref2_bf16 = qfunc_reference(obs_action2, params, num_hidden, False,
                                operand_dtype=jnp.bfloat16)
    ref2_f32 = qfunc_reference(obs_action2, params, num_hidden, False)
    assert out2.shape == (B2, 1), out2.shape
    assert jnp.allclose(out2, ref2_bf16, atol=2e-3, rtol=2e-3), "mismatch (bf16 grid)"
    assert jnp.allclose(out2, ref2_f32, atol=5e-2, rtol=5e-2), "bf16 drift vs f32"

    # --- 3) LayerNorm path (padded hiddens + masked stats), f32, exact -----
    key, kx3, kp3 = jax.random.split(key, 3)
    params_ln = init_qfunc_params(kp3, obs_action_dim, hiddens,
                                  with_layer_norm=True)
    packed_ln_f32 = pack_qfunc_params(params_ln, obs_action_dim, hiddens, True,
                                      matmul_dtype=jnp.float32)
    obs_action3 = jax.random.normal(kx3, (B, obs_action_dim), jnp.float32)
    out3 = jax.block_until_ready(
        qfunc_forward(obs_action3, packed_ln_f32, hiddens, True,
                      jnp.float32, 1024))
    ref3 = qfunc_reference(obs_action3, params_ln, num_hidden, True)
    assert jnp.allclose(out3, ref3, atol=1e-4, rtol=1e-4), "mismatch (f32 LN)"

    # --- 4) LayerNorm + bf16 + ragged batch (row padding, 2 grid steps) ----
    packed_ln_bf16 = pack_qfunc_params(params_ln, obs_action_dim, hiddens, True,
                                       matmul_dtype=jnp.bfloat16)
    key, kx4 = jax.random.split(key)
    B4 = 640
    obs_action4 = jax.random.normal(kx4, (B4, obs_action_dim), jnp.float32)
    out4 = jax.block_until_ready(
        qfunc_forward(obs_action4, packed_ln_bf16, hiddens, True,
                      jnp.bfloat16, 1024))
    ref4 = qfunc_reference(obs_action4, params_ln, num_hidden, True,
                           operand_dtype=jnp.bfloat16)
    assert out4.shape == (B4, 1), out4.shape
    assert jnp.allclose(out4, ref4, atol=2e-3, rtol=2e-3), "mismatch (bf16 LN)"

    print("KERNEL_OK")
</pallas_src>

<mosaic_0001>
module attributes {stable_mosaic.version = 11 : i64} {
  func.func @kernel(%arg0: i32, %arg1: memref<8x32xf32, #tpu.memory_space<vmem>>, %arg2: memref<128x32xf32, #tpu.memory_space<vmem>>, %arg3: memref<128x1xf32, #tpu.memory_space<vmem>>, %arg4: memref<128x128xf32, #tpu.memory_space<vmem>>, %arg5: memref<128x1xf32, #tpu.memory_space<vmem>>, %arg6: memref<128x1xf32, #tpu.memory_space<vmem>>, %arg7: memref<1x1xf32, #tpu.memory_space<vmem>>, %arg8: memref<1x8xf32, #tpu.memory_space<vmem>>) attributes {dimension_semantics = [#tpu.dimension_semantics<parallel>], iteration_bounds = array<i64: 1>, scalar_prefetch = 0 : i64, scratch_operands = 0 : i64, tpu.core_type = #tpu.core_type<tc>, window_params = [{transform_indices = @transform_0, window_bounds = array<i64: 8, 32>}, {pipeline_mode = #tpu.pipeline_mode<synchronous>, transform_indices = @transform_1, window_bounds = array<i64: 128, 32>}, {pipeline_mode = #tpu.pipeline_mode<synchronous>, transform_indices = @transform_2, window_bounds = array<i64: 128, 1>}, {pipeline_mode = #tpu.pipeline_mode<synchronous>, transform_indices = @transform_3, window_bounds = array<i64: 128, 128>}, {pipeline_mode = #tpu.pipeline_mode<synchronous>, transform_indices = @transform_4, window_bounds = array<i64: 128, 1>}, {pipeline_mode = #tpu.pipeline_mode<synchronous>, transform_indices = @transform_5, window_bounds = array<i64: 128, 1>}, {pipeline_mode = #tpu.pipeline_mode<synchronous>, transform_indices = @transform_6, window_bounds = array<i64: 1, 1>}, {transform_indices = @transform_7, window_bounds = array<i64: 1, 8>}]} {
    %c0 = arith.constant 0 : index
    %c0_0 = arith.constant 0 : index
    %0 = vector.load %arg1[%c0, %c0_0] : memref<8x32xf32, #tpu.memory_space<vmem>>, vector<8x32xf32>
    %c0_1 = arith.constant 0 : index
    %c0_2 = arith.constant 0 : index
    %1 = vector.load %arg2[%c0_1, %c0_2] : memref<128x32xf32, #tpu.memory_space<vmem>>, vector<128x32xf32>
    %c0_3 = arith.constant 0 : index
    %c0_4 = arith.constant 0 : index
    %2 = vector.load %arg3[%c0_3, %c0_4] : memref<128x1xf32, #tpu.memory_space<vmem>>, vector<128x1xf32>
    %cst = arith.constant dense<0.000000e+00> : vector<128x8xf32>
    %3 = tpu.matmul %1, %0, %cst {dimension_numbers = #tpu.dot_dimension_numbers<[1], [1], [0], [0], [0, 0, 1, 0], [], []>} : vector<128x32xf32>, vector<8x32xf32>, vector<128x8xf32> -> vector<128x8xf32>
    %4 = vector.broadcast %2 : vector<128x1xf32> to vector<128x8xf32>
    %5 = arith.addf %3, %4 : vector<128x8xf32>
    %cst_5 = arith.constant 0.000000e+00 : f32
    %6 = vector.broadcast %cst_5 : f32 to vector<128x8xf32>
    %7 = arith.maximumf %5, %6 : vector<128x8xf32>
    %c0_6 = arith.constant 0 : index
    %c0_7 = arith.constant 0 : index
    %8 = vector.load %arg4[%c0_6, %c0_7] : memref<128x128xf32, #tpu.memory_space<vmem>>, vector<128x128xf32>
    %c0_8 = arith.constant 0 : index
    %c0_9 = arith.constant 0 : index
    %9 = vector.load %arg5[%c0_8, %c0_9] : memref<128x1xf32, #tpu.memory_space<vmem>>, vector<128x1xf32>
    %cst_10 = arith.constant dense<0.000000e+00> : vector<128x8xf32>
    %10 = tpu.matmul %8, %7, %cst_10 {dimension_numbers = #tpu.dot_dimension_numbers<[1], [0], [0], [1], [0, 0, 1, 1], [], []>} : vector<128x128xf32>, vector<128x8xf32>, vector<128x8xf32> -> vector<128x8xf32>
    %11 = vector.broadcast %9 : vector<128x1xf32> to vector<128x8xf32>
    %12 = arith.addf %10, %11 : vector<128x8xf32>
    %cst_11 = arith.constant 0.000000e+00 : f32
    %13 = vector.broadcast %cst_11 : f32 to vector<128x8xf32>
    %14 = arith.maximumf %12, %13 : vector<128x8xf32>
    %c0_12 = arith.constant 0 : index
    %c0_13 = arith.constant 0 : index
    %15 = vector.load %arg6[%c0_12, %c0_13] : memref<128x1xf32, #tpu.memory_space<vmem>>, vector<128x1xf32>
    %c0_14 = arith.constant 0 : index
    %c0_15 = arith.constant 0 : index
    %16 = vector.load %arg7[%c0_14, %c0_15] : memref<1x1xf32, #tpu.memory_space<vmem>>, vector<1x1xf32>
    %17 = vector.broadcast %15 : vector<128x1xf32> to vector<128x8xf32>
    %18 = arith.mulf %14, %17 : vector<128x8xf32>
    %cst_16 = arith.constant dense<0.000000e+00> : vector<8xf32>
    %19 = vector.multi_reduction <add>, %18, %cst_16 [0] : vector<128x8xf32> to vector<8xf32>
    %20 = vector.shape_cast %19 : vector<8xf32> to vector<1x8xf32>
    %21 = vector.broadcast %16 : vector<1x1xf32> to vector<1x8xf32>
    %22 = arith.addf %20, %21 : vector<1x8xf32>
    %c0_17 = arith.constant 0 : index
    %c0_18 = arith.constant 0 : index
    %23 = vector.load %arg8[%c0_17, %c0_18] : memref<1x8xf32, #tpu.memory_space<vmem>>, vector<1x8xf32>
    tpu.vector_store %arg8[%c0_17, %c0_18], %22 {strides = array<i32>} : memref<1x8xf32, #tpu.memory_space<vmem>>, vector<1x8xf32>,
    return
  }
  func.func @transform_0(%arg0: i32) -> (i32, i32) {
    %c0_i32 = arith.constant 0 : i32
    %c0_i32_0 = arith.constant 0 : i32
    return %arg0, %c0_i32 : i32, i32
  }
  func.func @transform_1(%arg0: i32) -> (i32, i32) {
    %c0_i32 = arith.constant 0 : i32
    %c0_i32_0 = arith.constant 0 : i32
    %c0_i32_1 = arith.constant 0 : i32
    return %c0_i32, %c0_i32_0 : i32, i32
  }
  func.func @transform_2(%arg0: i32) -> (i32, i32) {
    %c0_i32 = arith.constant 0 : i32
    %c0_i32_0 = arith.constant 0 : i32
    %c0_i32_1 = arith.constant 0 : i32
    return %c0_i32, %c0_i32_0 : i32, i32
  }
  func.func @transform_3(%arg0: i32) -> (i32, i32) {
    %c0_i32 = arith.constant 0 : i32
    %c0_i32_0 = arith.constant 0 : i32
    %c0_i32_1 = arith.constant 0 : i32
    return %c0_i32, %c0_i32_0 : i32, i32
  }
  func.func @transform_4(%arg0: i32) -> (i32, i32) {
    %c0_i32 = arith.constant 0 : i32
    %c0_i32_0 = arith.constant 0 : i32
    %c0_i32_1 = arith.constant 0 : i32
    return %c0_i32, %c0_i32_0 : i32, i32
  }
  func.func @transform_5(%arg0: i32) -> (i32, i32) {
    %c0_i32 = arith.constant 0 : i32
    %c0_i32_0 = arith.constant 0 : i32
    %c0_i32_1 = arith.constant 0 : i32
    return %c0_i32, %c0_i32_0 : i32, i32
  }
  func.func @transform_6(%arg0: i32) -> (i32, i32) {
    %c0_i32 = arith.constant 0 : i32
    %c0_i32_0 = arith.constant 0 : i32
    %c0_i32_1 = arith.constant 0 : i32
    return %c0_i32, %c0_i32_0 : i32, i32
  }
  func.func @transform_7(%arg0: i32) -> (i32, i32) {
    %c0_i32 = arith.constant 0 : i32
    %c0_i32_0 = arith.constant 0 : i32
    return %c0_i32, %arg0 : i32, i32
  }
}

</mosaic_0001>

<bundles_post_ra>
// kernel: qfunc_forward.1
= control target key start
LH: loop header
LB: loop body
LE: loop exit
PB: predicated region body
PF: predicated region fallthrough
CT: control target
= control target key end

     0   :  { %s1086_s0 = inlined_call_operand.vmem [shape: f32[8,32], index: 0, kind: input, shape index: {}]   ;;  %s1087_s1 = inlined_call_operand.vmem [shape: f32[128,32], index: 1, kind: input, shape index: {}]   ;;  %s1088_s2 = inlined_call_operand.vmem [shape: f32[128,1], index: 2, kind: input, shape index: {}]   ;;  %s1089_s3 = inlined_call_operand.vmem [shape: f32[128,128], index: 3, kind: input, shape index: {}]   ;;  %s1090_s4 = inlined_call_operand.vmem [shape: f32[128,1], index: 4, kind: input, shape index: {}]   ;;  %s1091_s5 = inlined_call_operand.vmem [shape: f32[128,1], index: 5, kind: input, shape index: {}]   ;;  %s1092_s6 = inlined_call_operand.<no memory space> [shape: f32[1,1], index: 6, kind: input, shape index: {}]   ;;  %s1093_s7 = inlined_call_operand.hbm [shape: f32[1,8], index: 7, kind: output, shape index: {}]  }
   0x1   :  { %v12_v0 = vstv %s1092_s6 }
   0x2   :  { %13 = vst [vmem:[#allocation2] sm:$0x1] %v12_v0 }
   0x3   :  { %v29_v1 = vld [vmem:[%s1086_s0] sm:$0xff]  ;;  %vm142_vm0 = vcmask 261120   ;;  %v61_v2 = vld [vmem:[%s1088_s2 + $0x78] sm:$0xff]  ;;  %v725_v3 = vmov 0   ;;  %v59_v4 = vld [vmem:[%s1088_s2 + $0x68] sm:$0xff] }
   0x4   :  { %698 = vset.pattern.permute.xlu2 %v725_v3  ;;  %697 = vset.pattern.permute.xlu1 %v725_v3  ;;  %v57_v5 = vld [vmem:[%s1088_s2 + $0x58] sm:$0xff]  ;;  %v30_v6 = vld [vmem:[%s1087_s1] sm:$0xff]  ;;  %v40_v7 = vld [vmem:[%s1087_s1 + $0x50] sm:$0xff] }
   0x5   :  { %696 = vset.pattern.permute.xlu0 %v725_v3  ;;  %644 = vmatpush.xpose.msk.msra.mxu0 %vm142_vm0, %v29_v1  ;;  %v60_v8 = vld [vmem:[%s1088_s2 + $0x70] sm:$0xff]  ;;  %v58_v9 = vld [vmem:[%s1088_s2 + $0x60] sm:$0xff] }
   0x6   :  { %661 = vmatpush.xpose.msk.msra.mxu3 %vm142_vm0, %v29_v1  ;;  %139 = vperm.xlu0 %696, %v61_v2   ;;  %v56_v10 = vld [vmem:[%s1088_s2 + $0x50] sm:$0xff] }
   0x7   :  { %129 = vperm.xlu1 %697, %v59_v4   ;;  %119 = vperm.xlu2 %698, %v57_v5  }
   0x8   :  { %645 = vmatmul.msk.f32.vlgmr.msra.gmra.mxu0 %vm142_vm0, %v30_v6 }
   0x9   :  { %655 = vmatmul.msk.f32.vlgmr.msra.gmra.mxu3 %vm142_vm0, %v40_v7 }
   0xa   :  { %14 = vsyncpa [#allocation4], 0  ;;  %v31_v11 = vld [vmem:[%s1087_s1 + $0x8] sm:$0xff]  ;;  %v41_v12 = vld [vmem:[%s1087_s1 + $0x58] sm:$0xff]  ;;  %vm581_vm1 = vcmask 64512   ;;  %s635_s29 = sshll.u32 %s1093_s7, 4  ;;  %s636_s29 = int_to_ptr.hbm [resolvable:$true] %s635_s29 }
   0xb   :  { %v55_v13 = vld [vmem:[%s1088_s2 + $0x48] sm:$0xff]  ;;  %v54_v14 = vld [vmem:[%s1088_s2 + $0x40] sm:$0xff]  ;;  %v53_v15 = vld [vmem:[%s1088_s2 + $0x38] sm:$0xff]  ;;  %vm626_vm2 = vcmask 57344  }
   0xc   :  { %v32_v16 = vld [vmem:[%s1087_s1 + $0x10] sm:$0xff]  ;;  %v42_v17 = vld [vmem:[%s1087_s1 + $0x60] sm:$0xff]  ;;  %v51_v19 = vld [vmem:[%s1088_s2 + $0x28] sm:$0xff] }
   0xd   :  { %v52_v18 = vld [vmem:[%s1088_s2 + $0x30] sm:$0xff]  ;;  %v50_v20 = vld [vmem:[%s1088_s2 + $0x20] sm:$0xff]  ;;  %v33_v21 = vld [vmem:[%s1087_s1 + $0x18] sm:$0xff] }
   0xe   :  { %134 = vperm.xlu0 %696, %v60_v8   ;;  %v43_v22 = vld [vmem:[%s1087_s1 + $0x68] sm:$0xff]  ;;  %v49_v23 = vld [vmem:[%s1088_s2 + $0x18] sm:$0xff]  ;;  %v48_v24 = vld [vmem:[%s1088_s2 + $0x10] sm:$0xff] }
   0xf   :  { %124 = vperm.xlu1 %697, %v58_v9   ;;  %114 = vperm.xlu2 %698, %v56_v10   ;;  %v47_v25 = vld [vmem:[%s1088_s2 + $0x8] sm:$0xff]  ;;  %v34_v26 = vld [vmem:[%s1087_s1 + $0x20] sm:$0xff]  ;;  %v44_v27 = vld [vmem:[%s1087_s1 + $0x70] sm:$0xff] }
  0x10   :  { %646 = vmatmul.msk.f32.gmra.mxu0 %vm142_vm0, %v31_v11  ;;  %v46_v28 = vld [vmem:[%s1088_s2] sm:$0xff]  ;;  %v292_v30 = vld [vmem:[%s1090_s4 + $0x8] sm:$0xff]  ;;  %v45_v32 = vld [vmem:[%s1087_s1 + $0x78] sm:$0xff] }
  0x11   :  { %656 = vmatmul.msk.f32.gmra.mxu3 %vm142_vm0, %v41_v12  ;;  %v291_v29 = vld [vmem:[%s1090_s4] sm:$0xff]  ;;  %v35_v31 = vld [vmem:[%s1087_s1 + $0x28] sm:$0xff]  ;;  %v293_v33 = vld [vmem:[%s1090_s4 + $0x10] sm:$0xff] }
  0x12   :  { %v294_v34 = vld [vmem:[%s1090_s4 + $0x18] sm:$0xff]  ;;  %v295_v35 = vld [vmem:[%s1090_s4 + $0x20] sm:$0xff]  ;;  %v36_v36 = vld [vmem:[%s1087_s1 + $0x30] sm:$0xff] }
  0x13   :  { %v296_v37 = vld [vmem:[%s1090_s4 + $0x28] sm:$0xff]  ;;  %v297_v38 = vld [vmem:[%s1090_s4 + $0x30] sm:$0xff]  ;;  %v298_v39 = vld [vmem:[%s1090_s4 + $0x38] sm:$0xff] }
  0x14   :  { %v37_v40 = vld [vmem:[%s1087_s1 + $0x38] sm:$0xff]  ;;  %v299_v41 = vld [vmem:[%s1090_s4 + $0x40] sm:$0xff]  ;;  %v300_v42 = vld [vmem:[%s1090_s4 + $0x48] sm:$0xff] }
  0x15   :  { %v301_v43 = vld [vmem:[%s1090_s4 + $0x50] sm:$0xff]  ;;  %v38_v44 = vld [vmem:[%s1087_s1 + $0x40] sm:$0xff]  ;;  %v302_v45 = vld [vmem:[%s1090_s4 + $0x58] sm:$0xff] }
  0x16   :  { %109 = vperm.xlu0 %696, %v55_v13   ;;  %v303_v46 = vld [vmem:[%s1090_s4 + $0x60] sm:$0xff]  ;;  %v304_v47 = vld [vmem:[%s1090_s4 + $0x68] sm:$0xff]  ;;  %v305_v49 = vld [vmem:[%s1090_s4 + $0x70] sm:$0xff] }
  0x17   :  { %104 = vperm.xlu1 %697, %v54_v14   ;;  %99 = vperm.xlu2 %698, %v53_v15   ;;  %v39_v48 = vld [vmem:[%s1087_s1 + $0x48] sm:$0xff]  ;;  %v306_v50 = vld [vmem:[%s1090_s4 + $0x78] sm:$0xff]  ;;  %v468_v51 = vld [vmem:[%s1091_s5] sm:$0xff] }
  0x18   :  { %647 = vmatmul.msk.f32.gmra.mxu0 %vm142_vm0, %v32_v16  ;;  %v469_v52 = vld [vmem:[%s1091_s5 + $0x8] sm:$0xff]  ;;  %v470_v53 = vld [vmem:[%s1091_s5 + $0x10] sm:$0xff]  ;;  %v471_v54 = vld [vmem:[%s1091_s5 + $0x18] sm:$0xff] }
  0x19   :  { %657 = vmatmul.msk.f32.gmra.mxu3 %vm142_vm0, %v42_v17  ;;  %v472_v55 = vld [vmem:[%s1091_s5 + $0x20] sm:$0xff]  ;;  %v473_v56 = vld [vmem:[%s1091_s5 + $0x28] sm:$0xff]  ;;  %v474_v57 = vld [vmem:[%s1091_s5 + $0x30] sm:$0xff] }
  0x1a   :  { %v475_v58 = vld [vmem:[%s1091_s5 + $0x38] sm:$0xff]  ;;  %v476_v59 = vld [vmem:[%s1091_s5 + $0x40] sm:$0xff]  ;;  %v477_v60 = vld [vmem:[%s1091_s5 + $0x48] sm:$0xff] }
  0x1b   :  { %v478_v61 = vld [vmem:[%s1091_s5 + $0x50] sm:$0xff]  ;;  %v479_v62 = vld [vmem:[%s1091_s5 + $0x58] sm:$0xff]  ;;  %v480_v63 = vld [vmem:[%s1091_s5 + $0x60] sm:$0xff] }
  0x1c   :  { %v481_v0 = vld [vmem:[%s1091_s5 + $0x68] sm:$0xff]  ;;  %v482_v1 = vld [vmem:[%s1091_s5 + $0x70] sm:$0xff]  ;;  %v483_v2 = vld [vmem:[%s1091_s5 + $0x78] sm:$0xff] }
  0x1d   :  { %v484_v3 = vld [vmem:[#allocation2] sm:$0x1] }
  0x1e   :  { %94 = vperm.xlu0 %696, %v52_v18  }
  0x1f   :  { %89 = vperm.xlu1 %697, %v51_v19   ;;  %84 = vperm.xlu2 %698, %v50_v20  }
  0x20   :  { %648 = vmatmul.msk.f32.gmra.mxu0 %vm142_vm0, %v33_v21 }
  0x21   :  { %658 = vmatmul.msk.f32.gmra.mxu3 %vm142_vm0, %v43_v22 }
  0x26   :  { %79 = vperm.xlu0 %696, %v49_v23  }
  0x27   :  { %74 = vperm.xlu1 %697, %v48_v24   ;;  %69 = vperm.xlu2 %698, %v47_v25  }
  0x28   :  { %649 = vmatmul.msk.f32.gmra.mxu0 %vm142_vm0, %v34_v26 }
  0x29   :  { %659 = vmatmul.msk.f32.gmra.mxu3 %vm142_vm0, %v44_v27 }
  0x2e   :  { %64 = vperm.xlu0 %696, %v46_v28  }
  0x2f   :  { %309 = vperm.xlu1 %697, %v291_v29   ;;  %314 = vperm.xlu2 %698, %v292_v30  }
  0x30   :  { %650 = vmatmul.msk.f32.gmra.mxu0 %vm142_vm0, %v35_v31 }
  0x31   :  { %660 = vmatmul.msk.f32.gmra.mxu3 %vm142_vm0, %v45_v32 }
  0x36   :  { %319 = vperm.xlu0 %696, %v293_v33  }
  0x37   :  { %324 = vperm.xlu1 %697, %v294_v34   ;;  %329 = vperm.xlu2 %698, %v295_v35  }
  0x38   :  { %651 = vmatmul.msk.f32.gmra.mxu0 %vm142_vm0, %v36_v36 }
  0x3e   :  { %334 = vperm.xlu0 %696, %v296_v37  }
  0x3f   :  { %339 = vperm.xlu1 %697, %v297_v38   ;;  %344 = vperm.xlu2 %698, %v298_v39  }
  0x40   :  { %652 = vmatmul.msk.f32.gmra.mxu0 %vm142_vm0, %v37_v40 }
  0x46   :  { %349 = vperm.xlu0 %696, %v299_v41  }
  0x47   :  { %354 = vperm.xlu1 %697, %v300_v42   ;;  %359 = vperm.xlu2 %698, %v301_v43  }
  0x48   :  { %653 = vmatmul.msk.f32.gmra.mxu0 %vm142_vm0, %v38_v44 }
  0x4e   :  { %364 = vperm.xlu0 %696, %v302_v45  }
  0x4f   :  { %369 = vperm.xlu1 %697, %v303_v46   ;;  %374 = vperm.xlu2 %698, %v304_v47  }
  0x50   :  { %654 = vmatmul.msk.f32.gmra.mxu0 %vm142_vm0, %v39_v48 }
  0x56   :  { %379 = vperm.xlu0 %696, %v305_v49  }
  0x57   :  { %384 = vperm.xlu1 %697, %v306_v50   ;;  %487 = vperm.xlu2 %698, %v468_v51  }
  0x5e   :  { %492 = vperm.xlu0 %696, %v469_v52  }
  0x5f   :  { %497 = vperm.xlu1 %697, %v470_v53   ;;  %502 = vperm.xlu2 %698, %v471_v54  }
  0x61   :  { %v120_v17 = vpop.permute.xlu2 %119 }
  0x66   :  { %507 = vperm.xlu0 %696, %v472_v55  }
  0x67   :  { %512 = vperm.xlu1 %697, %v473_v56   ;;  %517 = vperm.xlu2 %698, %v474_v57  }
  0x69   :  { %v115_v30 = vpop.permute.xlu2 %114 }
  0x6e   :  { %522 = vperm.xlu0 %696, %v475_v58  }
  0x6f   :  { %527 = vperm.xlu1 %697, %v476_v59   ;;  %532 = vperm.xlu2 %698, %v477_v60  }
  0x71   :  { %v100_v39 = vpop.permute.xlu2 %99 }
  0x76   :  { %537 = vperm.xlu0 %696, %v478_v61  }
  0x77   :  { %542 = vperm.xlu1 %697, %v479_v62   ;;  %547 = vperm.xlu2 %698, %v480_v63  }
  0x78   :  { %v140_v13 = vpop.permute.xlu0 %139 }
  0x79   :  { %v130_v16 = vpop.permute.xlu1 %129  ;;  %v85_v47 = vpop.permute.xlu2 %84 }
  0x7e   :  { %552 = vperm.xlu0 %696, %v481_v0  }
  0x7f   :  { %557 = vperm.xlu1 %697, %v482_v1   ;;  %562 = vperm.xlu2 %698, %v483_v2  }
  0x80   :  { %v135_v18 = vpop.permute.xlu0 %134 }
  0x81   :  { %v125_v26 = vpop.permute.xlu1 %124  ;;  %v70_v60 = vpop.permute.xlu2 %69 }
  0x85   :  { %v983_v4 = vpop.f32.mrf.mxu0 }
  0x86   :  { %621 = vperm.xlu0 %696, %v484_v3  }
  0x88   :  { %v110_v31 = vpop.permute.xlu0 %109 }
  0x89   :  { %v105_v37 = vpop.permute.xlu1 %104 }
  0x8c   :  { %v241_v5 = vpop.f32.mrf.mxu3 }
  0x8d   :  { %v985_v6 = vpop.f32.mrf.mxu0  ;;  %v242_v32 = vadd.f32 %v241_v5, %v115_v30  ;;  %v275_v5 = vld [vmem:[%s1089_s3] sm:$0xff] }
  0x8e   :  { %v215_v62 = vadd.f32 %v985_v6, %v70_v60  ;;  %v282_v6 = vld [vmem:[%s1089_s3 + $0x38] sm:$0xff] }
  0x8f   :  { %v269_v36 = vmax.f32 %v242_v32, 0.0 }
  0x90   :  { %v95_v40 = vpop.permute.xlu0 %94  ;;  %v260_v2 = vmax.f32 %v215_v62, 0.0 }
  0x91   :  { %v90_v41 = vpop.permute.xlu1 %89 }
  0x94   :  { %v244_v7 = vpop.f32.mrf.mxu3 }
  0x95   :  { %v987_v8 = vpop.f32.mrf.mxu0  ;;  %v245_v28 = vadd.f32 %v244_v7, %v120_v17  ;;  %v276_v7 = vld [vmem:[%s1089_s3 + $0x8] sm:$0xff]  ;;  %v287_v17 = vld [vmem:[%s1089_s3 + $0x60] sm:$0xff] }
  0x97   :  { %v270_v35 = vmax.f32 %v245_v28, 0.0 }
  0x98   :  { %v80_v48 = vpop.permute.xlu0 %79 }
  0x99   :  { %v75_v55 = vpop.permute.xlu1 %74 }
  0x9a   :  { %v218_v58 = vadd.f32 %v987_v8, %v75_v55  ;;  %v283_v8 = vld [vmem:[%s1089_s3 + $0x40] sm:$0xff] }
  0x9c   :  { %v247_v9 = vpop.f32.mrf.mxu3  ;;  %v261_v0 = vmax.f32 %v218_v58, 0.0 }
  0x9d   :  { %v989_v10 = vpop.f32.mrf.mxu0  ;;  %v248_v27 = vadd.f32 %v247_v9, %v125_v26  ;;  %v290_v9 = vld [vmem:[%s1089_s3 + $0x78] sm:$0xff] }
  0x9e   :  { %v221_v56 = vadd.f32 %v989_v10, %v80_v48  ;;  %v277_v10 = vld [vmem:[%s1089_s3 + $0x10] sm:$0xff] }
  0x9f   :  { %v271_v33 = vmax.f32 %v248_v27, 0.0 }
  0xa0   :  { %v65_v61 = vpop.permute.xlu0 %64  ;;  %v262_v63 = vmax.f32 %v221_v56, 0.0 }
  0xa1   :  { %v212_v1 = vadd.f32 %v983_v4, %v65_v61  ;;  %v289_v4 = vld [vmem:[%s1089_s3 + $0x70] sm:$0xff] }
  0xa3   :  { %v259_v3 = vmax.f32 %v212_v1, 0.0 }
  0xa4   :  { %v250_v11 = vpop.f32.mrf.mxu3 }
  0xa5   :  { %v991_v12 = vpop.f32.mrf.mxu0  ;;  %v251_v23 = vadd.f32 %v250_v11, %v130_v16  ;;  %v284_v11 = vld [vmem:[%s1089_s3 + $0x48] sm:$0xff] }
  0xa6   :  { %v224_v53 = vadd.f32 %v991_v12, %v85_v47  ;;  %v278_v12 = vld [vmem:[%s1089_s3 + $0x18] sm:$0xff]  ;;  %v280_v16 = vld [vmem:[%s1089_s3 + $0x28] sm:$0xff] }
  0xa7   :  { %v272_v29 = vmax.f32 %v251_v23, 0.0 }
  0xa8   :  { %v263_v59 = vmax.f32 %v224_v53, 0.0 }
  0xac   :  { %v253_v14 = vpop.f32.mrf.mxu3 }
  0xad   :  { %v226_v15 = vpop.f32.mrf.mxu0  ;;  %v254_v19 = vadd.f32 %v253_v14, %v135_v18  ;;  %v279_v14 = vld [vmem:[%s1089_s3 + $0x20] sm:$0xff]  ;;  %v281_v18 = vld [vmem:[%s1089_s3 + $0x30] sm:$0xff] }
  0xae   :  { %v227_v51 = vadd.f32 %v226_v15, %v90_v41  ;;  %v286_v15 = vld [vmem:[%s1089_s3 + $0x58] sm:$0xff] }
  0xaf   :  { %v273_v24 = vmax.f32 %v254_v19, 0.0  ;;  %v288_v19 = vld [vmem:[%s1089_s3 + $0x68] sm:$0xff] }
  0xb0   :  { %v264_v57 = vmax.f32 %v227_v51, 0.0 }
  0xb4   :  { %v256_v20 = vpop.f32.mrf.mxu3 }
  0xb5   :  { %v257_v21 = vadd.f32 %v256_v20, %v140_v13  ;;  %v229_v22 = vpop.f32.mrf.mxu0  ;;  %v285_v13 = vld [vmem:[%s1089_s3 + $0x50] sm:$0xff]  ;;  %v310_v20 = vpop.permute.xlu1 %309  ;;  %s726_s3 = smov [#allocation3]  }
  0xb6   :  { %v230_v49 = vadd.f32 %v229_v22, %v95_v40  ;;  %v320_v22 = vpop.permute.xlu0 %319  ;;  %s633_s27 = sshll.u32 %s726_s3, 4  ;;  %s634_s27 = int_to_ptr.vmem [resolvable:$true] %s633_s27 }
  0xb7   :  { %v274_v25 = vmax.f32 %v257_v21, 0.0  ;;  %v315_v21 = vpop.permute.xlu2 %314 }
  0xb8   :  { %v265_v54 = vmax.f32 %v230_v49, 0.0 }
  0xb9   :  { %387 = vmatpush.msra.mxu1 %v274_v25  ;;  %662 = vmatpush.msra.mxu2 %v274_v25 }
  0xba   :  { %663 = vmatpush.msrb.mxu3 %v274_v25 }
  0xbb   :  { %388 = vmatpush.msra.mxu1 %v273_v24  ;;  %664 = vmatpush.msra.mxu2 %v273_v24 }
  0xbc   :  { %665 = vmatpush.msrb.mxu3 %v273_v24 }
  0xbd   :  { %389 = vmatpush.msra.mxu1 %v272_v29  ;;  %666 = vmatpush.msra.mxu2 %v272_v29  ;;  %v232_v34 = vpop.f32.mrf.mxu0  ;;  %v325_v23 = vpop.permute.xlu1 %324 }
  0xbe   :  { %667 = vmatpush.msrb.mxu3 %v272_v29  ;;  %v233_v45 = vadd.f32 %v232_v34, %v100_v39  ;;  %v335_v25 = vpop.permute.xlu0 %334 }
  0xbf   :  { %390 = vmatpush.msra.mxu1 %v271_v33  ;;  %668 = vmatpush.msra.mxu2 %v271_v33  ;;  %v330_v24 = vpop.permute.xlu2 %329 }
  0xc0   :  { %669 = vmatpush.msrb.mxu3 %v271_v33  ;;  %v266_v52 = vmax.f32 %v233_v45, 0.0 }
  0xc1   :  { %391 = vmatpush.msra.mxu1 %v270_v35  ;;  %670 = vmatpush.msra.mxu2 %v270_v35 }
  0xc2   :  { %671 = vmatpush.msrb.mxu3 %v270_v35 }
  0xc3   :  { %392 = vmatpush.msra.mxu1 %v269_v36  ;;  %672 = vmatpush.msra.mxu2 %v269_v36 }
  0xc4   :  { %673 = vmatpush.msrb.mxu3 %v269_v36 }
  0xc5   :  { %v235_v38 = vpop.f32.mrf.mxu0  ;;  %v1046_v26 = vpop.permute.xlu1 %339 }
  0xc6   :  { %v236_v43 = vadd.f32 %v235_v38, %v105_v37  ;;  %v350_v28 = vpop.permute.xlu0 %349 }
  0xc7   :  { %v345_v27 = vpop.permute.xlu2 %344 }
  0xc8   :  { %v267_v50 = vmax.f32 %v236_v43, 0.0 }
  0xcd   :  { %v238_v42 = vpop.f32.mrf.mxu0  ;;  %v355_v29 = vpop.permute.xlu1 %354 }
  0xce   :  { %v239_v44 = vadd.f32 %v238_v42, %v110_v31  ;;  %v1050_v32 = vpop.permute.xlu0 %364 }
  0xcf   :  { %v1048_v30 = vpop.permute.xlu2 %359 }
  0xd0   :  { %v268_v46 = vmax.f32 %v239_v44, 0.0 }
  0xd2   :  { %393 = vmatpush.msra.mxu1 %v268_v46  ;;  %674 = vmatpush.msra.mxu2 %v268_v46 }
  0xd3   :  { %675 = vmatpush.msrb.mxu3 %v268_v46 }
  0xd4   :  { %394 = vmatpush.msra.mxu1 %v267_v50  ;;  %676 = vmatpush.msra.mxu2 %v267_v50 }
  0xd5   :  { %677 = vmatpush.msrb.mxu3 %v267_v50  ;;  %v1052_v33 = vpop.permute.xlu1 %369 }
  0xd6   :  { %395 = vmatpush.msra.mxu1 %v266_v52  ;;  %678 = vmatpush.msra.mxu2 %v266_v52  ;;  %v1056_v37 = vpop.permute.xlu0 %379 }
  0xd7   :  { %679 = vmatpush.msrb.mxu3 %v266_v52  ;;  %v1054_v34 = vpop.permute.xlu2 %374 }
  0xd8   :  { %396 = vmatpush.msra.mxu1 %v265_v54  ;;  %680 = vmatpush.msra.mxu2 %v265_v54 }
  0xd9   :  { %681 = vmatpush.msrb.mxu3 %v265_v54 }
  0xda   :  { %397 = vmatpush.msra.mxu1 %v264_v57  ;;  %682 = vmatpush.msra.mxu2 %v264_v57 }
  0xdb   :  { %683 = vmatpush.msrb.mxu3 %v264_v57 }
  0xdc   :  { %398 = vmatpush.msra.mxu1 %v263_v59  ;;  %684 = vmatpush.msra.mxu2 %v263_v59 }
  0xdd   :  { %685 = vmatpush.msrb.mxu3 %v263_v59  ;;  %v1058_v39 = vpop.permute.xlu1 %384 }
  0xde   :  { %399 = vmatpush.msra.mxu1 %v262_v63  ;;  %686 = vmatpush.msra.mxu2 %v262_v63  ;;  %v493_v43 = vpop.permute.xlu0 %492 }
  0xdf   :  { %687 = vmatpush.msrb.mxu3 %v262_v63  ;;  %v488_v41 = vpop.permute.xlu2 %487 }
  0xe0   :  { %400 = vmatpush.msra.mxu1 %v261_v0  ;;  %688 = vmatpush.msra.mxu2 %v261_v0 }
  0xe1   :  { %689 = vmatpush.msrb.mxu3 %v261_v0 }
  0xe2   :  { %401 = vmatpush.msra.mxu1 %v260_v2  ;;  %690 = vmatpush.msra.mxu2 %v260_v2 }
  0xe3   :  { %691 = vmatpush.msrb.mxu3 %v260_v2 }
  0xe4   :  { %402 = vmatpush.msra.mxu1 %v259_v3  ;;  %692 = vmatpush.msra.mxu2 %v259_v3 }
  0xe5   :  { %693 = vmatpush.msrb.mxu3 %v259_v3  ;;  %403 = vmatmul.f32.vlgmr.msra.gmra.mxu1 %v275_v5  ;;  %v498_v45 = vpop.permute.xlu1 %497 }
  0xe6   :  { %424 = vmatmul.f32.vlgmr.msra.gmra.mxu2 %v282_v6  ;;  %445 = vmatmul.f32.vlgmr.msrb.gmra.mxu3 %v289_v4  ;;  %v508_v52 = vpop.permute.xlu0 %507 }
  0xe7   :  { %v503_v46 = vpop.permute.xlu2 %502 }
  0xed   :  { %406 = vmatmul.f32.gmra.mxu1 %v276_v7  ;;  %v513_v55 = vpop.permute.xlu1 %512 }
  0xee   :  { %427 = vmatmul.f32.gmra.mxu2 %v283_v8  ;;  %448 = vmatmul.f32.gmra.mxu3 %v290_v9  ;;  %v523_v7 = vpop.permute.xlu0 %522 }
  0xef   :  { %v518_v56 = vpop.permute.xlu2 %517 }
  0xf5   :  { %409 = vmatmul.f32.gmra.mxu1 %v277_v10 }
  0xf6   :  { %430 = vmatmul.f32.gmra.mxu2 %v284_v11 }
  0xfd   :  { %412 = vmatmul.f32.gmra.mxu1 %v278_v12  ;;  %v528_v12 = vpop.permute.xlu1 %527 }
  0xfe   :  { %433 = vmatmul.f32.gmra.mxu2 %v285_v13 }
 0x105   :  { %415 = vmatmul.f32.gmra.mxu1 %v279_v14  ;;  %v533_v14 = vpop.permute.xlu2 %532 }
 0x106   :  { %436 = vmatmul.f32.gmra.mxu2 %v286_v15 }
 0x10d   :  { %418 = vmatmul.f32.gmra.mxu1 %v280_v16 }
 0x10e   :  { %439 = vmatmul.f32.gmra.mxu2 %v287_v17 }
 0x115   :  { %421 = vmatmul.f32.gmra.mxu1 %v281_v18 }
 0x116   :  { %442 = vmatmul.f32.gmra.mxu2 %v288_v19 }
 0x162   :  { %v404_v31 = vpop.f32.mrf.mxu1 }
 0x163   :  { %v405_v50 = vadd.f32 %v404_v31, %v310_v20 }
 0x165   :  { %v452_v57 = vmax.f32 %v405_v50, 0.0  ;;  %v543_v50 = vpop.permute.xlu1 %542 }
 0x167   :  { %v565_v0 = vmul.f32 %v488_v41, %v452_v57 }
 0x169   :  { %v425_v35 = vpop.f32.mrf.mxu2  ;;  %v582_v8 = vsel %vm581_vm1, %v565_v0, 0.0  ;;  %v446_v19 = vpop.f32.mrf.mxu3 }
 0x16a   :  { %v407_v36 = vpop.f32.mrf.mxu1  ;;  %v426_v9 = vadd.f32 %v425_v35, %v345_v27 }
 0x16b   :  { %v408_v47 = vadd.f32 %v407_v36, %v315_v21 }
 0x16d   :  { %v453_v53 = vmax.f32 %v408_v47, 0.0 }
 0x16f   :  { %v566_v60 = vmul.f32 %v493_v43, %v453_v53 }
 0x171   :  { %v428_v38 = vpop.f32.mrf.mxu2  ;;  %v583_v5 = vsel %vm581_vm1, %v566_v60, 0.0 }
 0x172   :  { %v410_v40 = vpop.f32.mrf.mxu1  ;;  %v584_v13 = vadd.f32 %v583_v5, %v582_v8  ;;  %v429_v15 = vadd.f32 %v428_v38, %v350_v28 }
 0x173   :  { %v411_v51 = vadd.f32 %v410_v40, %v320_v22  ;;  %v459_v22 = vmax.f32 %v426_v9, 0.0 }
 0x174   :  { %v460_v31 = vmax.f32 %v429_v15, 0.0 }
 0x175   :  { %v454_v58 = vmax.f32 %v411_v51, 0.0  ;;  %v572_v40 = vmul.f32 %v523_v7, %v459_v22  ;;  %v558_v7 = vpop.permute.xlu1 %557 }
 0x177   :  { %v567_v1 = vmul.f32 %v498_v45, %v454_v58  ;;  %v538_v45 = vpop.permute.xlu0 %537 }
 0x179   :  { %v431_v42 = vpop.f32.mrf.mxu2  ;;  %v585_v10 = vsel %vm581_vm1, %v567_v1, 0.0 }
 0x17a   :  { %v413_v44 = vpop.f32.mrf.mxu1  ;;  %v586_v20 = vadd.f32 %v585_v10, %v584_v13 }
 0x17b   :  { %v414_v54 = vadd.f32 %v413_v44, %v325_v23  ;;  %v432_v23 = vadd.f32 %v431_v42, %v355_v29  ;;  %v573_v29 = vmul.f32 %v528_v12, %v460_v31 }
 0x17d   :  { %v455_v61 = vmax.f32 %v414_v54, 0.0  ;;  %v461_v41 = vmax.f32 %v432_v23, 0.0  ;;  %v548_v54 = vpop.permute.xlu2 %547  ;;  %v597_v57 = vsel %vm581_vm1, %v573_v29, 0.0 }
 0x17f   :  { %v568_v6 = vmul.f32 %v503_v46, %v455_v61  ;;  %v574_v51 = vmul.f32 %v533_v14, %v461_v41 }
 0x181   :  { %v434_v48 = vpop.f32.mrf.mxu2  ;;  %v587_v16 = vsel %vm581_vm1, %v568_v6, 0.0  ;;  %v599_v61 = vsel %vm581_vm1, %v574_v51, 0.0 }
 0x182   :  { %v416_v49 = vpop.f32.mrf.mxu1  ;;  %v588_v27 = vadd.f32 %v587_v16, %v586_v20  ;;  %v435_v35 = vadd.f32 %v434_v48, %v1048_v30  ;;  %v595_v48 = vsel %vm581_vm1, %v572_v40, 0.0 }
 0x183   :  { %v417_v59 = vadd.f32 %v416_v49, %v330_v24 }
 0x184   :  { %v462_v42 = vmax.f32 %v435_v35, 0.0 }
 0x185   :  { %v456_v2 = vmax.f32 %v417_v59, 0.0  ;;  %v563_v10 = vpop.permute.xlu2 %562 }
 0x186   :  { %v575_v58 = vmul.f32 %v538_v45, %v462_v42 }
 0x187   :  { %v569_v11 = vmul.f32 %v508_v52, %v456_v2 }
 0x189   :  { %v437_v62 = vpop.f32.mrf.mxu2  ;;  %v589_v24 = vsel %vm581_vm1, %v569_v11, 0.0 }
 0x18a   :  { %v419_v63 = vpop.f32.mrf.mxu1  ;;  %v590_v38 = vadd.f32 %v589_v24, %v588_v27  ;;  %v438_v43 = vadd.f32 %v437_v62, %v1050_v32  ;;  %v449_v32 = vpop.f32.mrf.mxu3 }
 0x18b   :  { %v420_v3 = vadd.f32 %v419_v63, %v335_v25  ;;  %v450_v60 = vadd.f32 %v449_v32, %v1058_v39 }
 0x18c   :  { %v463_v52 = vmax.f32 %v438_v43, 0.0 }
 0x18d   :  { %v457_v4 = vmax.f32 %v420_v3, 0.0  ;;  %v553_v3 = vpop.permute.xlu0 %552  ;;  %v467_v6 = vmax.f32 %v450_v60, 0.0 }
 0x18e   :  { %v576_v62 = vmul.f32 %v543_v50, %v463_v52 }
 0x18f   :  { %v570_v17 = vmul.f32 %v513_v55, %v457_v4  ;;  %v580_v12 = vmul.f32 %v563_v10, %v467_v6 }
 0x191   :  { %v440_v18 = vpop.f32.mrf.mxu2  ;;  %v591_v36 = vsel %vm581_vm1, %v570_v17, 0.0  ;;  %v611_v17 = vsel %vm581_vm1, %v580_v12, 0.0 }
 0x192   :  { %v422_v21 = vpop.f32.mrf.mxu1  ;;  %v592_v46 = vadd.f32 %v591_v36, %v590_v38  ;;  %v441_v47 = vadd.f32 %v440_v18, %v1052_v33 }
 0x193   :  { %v423_v25 = vadd.f32 %v422_v21, %v1046_v26 }
 0x194   :  { %v464_v33 = vmax.f32 %v441_v47, 0.0 }
 0x195   :  { %v458_v28 = vmax.f32 %v423_v25, 0.0  ;;  %v622_v23 = vpop.permute.xlu0 %621 }
 0x196   :  { %v577_v2 = vmul.f32 %v548_v54, %v464_v33  ;;  %v624_v25 = vperm.slane %v622_v23, 0 }
 0x197   :  { %v571_v44 = vmul.f32 %v518_v56, %v458_v28  ;;  %v447_v56 = vadd.f32 %v446_v19, %v1056_v37  ;;  %v603_v37 = vsel %vm581_vm1, %v576_v62, 0.0 }
 0x198   :  { %v605_v39 = vsel %vm581_vm1, %v577_v2, 0.0 }
 0x199   :  { %v593_v26 = vsel %vm581_vm1, %v571_v44, 0.0  ;;  %v443_v49 = vpop.f32.mrf.mxu2  ;;  %v466_v1 = vmax.f32 %v447_v56, 0.0 }
 0x19a   :  { %v594_v30 = vadd.f32 %v593_v26, %v592_v46  ;;  %v444_v53 = vadd.f32 %v443_v49, %v1054_v34  ;;  %v601_v34 = vsel %vm581_vm1, %v575_v58, 0.0 }
 0x19b   :  { %v579_v9 = vmul.f32 %v558_v7, %v466_v1 }
 0x19c   :  { %v596_v55 = vadd.f32 %v595_v48, %v594_v30  ;;  %v465_v63 = vmax.f32 %v444_v53, 0.0 }
 0x19d   :  { %v609_v15 = vsel %vm581_vm1, %v579_v9, 0.0 }
 0x19e   :  { %v598_v59 = vadd.f32 %v597_v57, %v596_v55  ;;  %v578_v4 = vmul.f32 %v553_v3, %v465_v63 }
 0x1a0   :  { %v600_v0 = vadd.f32 %v599_v61, %v598_v59  ;;  %v607_v13 = vsel %vm581_vm1, %v578_v4, 0.0 }
 0x1a2   :  { %v602_v5 = vadd.f32 %v601_v34, %v600_v0 }
 0x1a4   :  { %v604_v8 = vadd.f32 %v603_v37, %v602_v5 }
 0x1a6   :  { %v606_v11 = vadd.f32 %v605_v39, %v604_v8 }
 0x1a8   :  { %v608_v14 = vadd.f32 %v607_v13, %v606_v11 }
 0x1aa   :  { %v610_v16 = vadd.f32 %v609_v15, %v608_v14 }
 0x1ac   :  { %v612_v18 = vadd.f32 %v611_v17, %v610_v16 }
 0x1ae   :  { %v613_v19 = vrot.slane %v612_v18, 4 }
 0x1b0   :  { %v614_v20 = vadd.f32 %v613_v19, %v612_v18 }
 0x1b2   :  { %v615_v21 = vrot.slane %v614_v20, 2 }
 0x1b4   :  { %v616_v22 = vadd.f32 %v615_v21, %v614_v20 }
 0x1b6   :  { %v617_v24 = vrot.slane %v616_v22, 1 }
 0x1b8   :  { %v618_v27 = vadd.f32 %v617_v24, %v616_v22 }
 0x1ba   :  { %v625_v31 = vadd.f32 %v624_v25, %v618_v27 }
 0x1bc   :  { %627 = vst.msk [vmem:[#allocation3] sm:$0x1] %vm626_vm2, %v625_v31 }
 0x1bd   :  { %638 = dma.vmem_to_hbm [thread:$0]  %s634_s27, 16, %s636_s29, [#allocation4]  }
 0x1be   :  { %723 = dma.done.wait [#allocation4], 16  }
 0x1bf   :  { %724 = vsyncadd [#allocation4], 4294967280 }
 0x1c0   :  { %643 = vsyncpa [#allocation4], 1 }

</bundles_post_ra>
